<compile_context>
chip_gen: v5e
topology: v5e:2x2
jax: 0.10.0
libtpu: 0.0.40
codegen_flags: <defaults>
</compile_context>

<pallas_src>
import functools

import jax
import jax.numpy as jnp
from jax.experimental import pallas as pl
from jax.experimental.pallas import tpu as pltpu

SMOOTHING = 0.2


def byol_loss_kernel(pred_ref, target_ref, o_ref, acc_ref, *,
                     batch, block_b, smoothing):
    i = pl.program_id(0)

    @pl.when(i == 0)
    def _():
        acc_ref[...] = jnp.zeros_like(acc_ref)

    pred = pred_ref[...].astype(jnp.float32)
    target = target_ref[...].astype(jnp.float32)
    d = pred.shape[-1]

    # Per-row inverse L2 norms via rsqrt (EUP) instead of sqrt + divide.
    inv_p = jax.lax.rsqrt(jnp.sum(pred * pred, axis=-1, keepdims=True))     # (TB,1)
    inv_t = jax.lax.rsqrt(jnp.sum(target * target, axis=-1, keepdims=True))  # (TB,1)

    # Per-row raw reductions (lane/XLU); no normalized/smoothed tensors built.
    row_dot = jnp.sum(pred * target, axis=-1, keepdims=True)  # (TB,1)
    row_sum = jnp.sum(pred, axis=-1, keepdims=True)            # (TB,1)

    contrib = ((1.0 - smoothing) * row_dot * inv_p * inv_t
               + (smoothing / d) * row_sum * inv_p)            # (TB,1)

    # Mask rows past the true batch size (last partial tile reads padding).
    row_ids = i * block_b + jax.lax.broadcasted_iota(jnp.int32, contrib.shape, 0)
    contrib = jnp.where(row_ids < batch, contrib, 0.0)

    acc_ref[...] += jnp.sum(contrib, axis=0, keepdims=True)

    @pl.when(i == pl.num_programs(0) - 1)
    def _():
        o_ref[...] = 2.0 - (2.0 / d) * acc_ref[...]


def byol_loss(pred, target, smoothing=SMOOTHING, block_rows=None):
    B, D = pred.shape
    assert target.shape == (B, D)

    # Batch tile: ~2 MiB per input block (x 2 inputs x 2 pipeline buffers
    # = ~8 MiB of VMEM) -> safe on v5e (16 MiB scoped), v6e (32), v7x (32/64).
    if block_rows is None:
        tb = max(1, (2 * 1024 * 1024) // (D * 4))
    else:
        tb = block_rows
    if tb >= B:
        tb = B                       # full batch in one tile (always legal)
    else:
        tb = max(8, (tb // 8) * 8)   # satisfy (8, 128) sublane constraint
    grid = (pl.cdiv(B, tb),)

    kernel = functools.partial(
        byol_loss_kernel, batch=B, block_b=tb, smoothing=smoothing)

    cost = pl.CostEstimate(
        flops=6 * B * D,
        transcendentals=2 * B,
        bytes_accessed=2 * B * D * pred.dtype.itemsize + 4,
    )

    out = pl.pallas_call(
        kernel,
        out_shape=jax.ShapeDtypeStruct((1, 1), jnp.float32),
        grid=grid,
        in_specs=[
            pl.BlockSpec((tb, D), lambda i: (i, 0)),
            pl.BlockSpec((tb, D), lambda i: (i, 0)),
        ],
        out_specs=pl.BlockSpec((1, 1), lambda i: (0, 0)),
        scratch_shapes=[pltpu.VMEM((1, 1), jnp.float32)],
        compiler_params=pltpu.CompilerParams(
            dimension_semantics=("arbitrary",),
        ),
        cost_estimate=cost,
    )(pred, target)
    return out[0, 0]


def byol_loss_ref(pred, target, smoothing=SMOOTHING):
    pred = pred / jnp.linalg.norm(pred, axis=-1, keepdims=True)
    target = target / jnp.linalg.norm(target, axis=-1, keepdims=True)
    smoothed = (1 - smoothing) * target + smoothing / target.shape[-1]
    return 2 - 2 * jnp.mean(jnp.sum(pred * smoothed, axis=0))


if __name__ == "__main__":
    key = jax.random.PRNGKey(0)

    # Case 1: small, single tile.
    k1, k2, k3, k4 = jax.random.split(key, 4)
    B, D = 8, 128
    pred = jax.random.normal(k1, (B, D), dtype=jnp.float32)
    target = jax.random.normal(k2, (B, D), dtype=jnp.float32)
    loss = jax.block_until_ready(byol_loss(pred, target))
    ref = jax.block_until_ready(byol_loss_ref(pred, target))
    assert jnp.allclose(loss, ref, atol=1e-4, rtol=1e-4), (loss, ref)

    # Case 2: multi-tile with a masked partial last tile (B not multiple of TB).
    B2, D2 = 20, 128
    pred2 = jax.random.normal(k3, (B2, D2), dtype=jnp.float32)
    target2 = jax.random.normal(k4, (B2, D2), dtype=jnp.float32)
    loss2 = jax.block_until_ready(byol_loss(pred2, target2, block_rows=8))
    ref2 = jax.block_until_ready(byol_loss_ref(pred2, target2))
    assert jnp.allclose(loss2, ref2, atol=1e-4, rtol=1e-4), (loss2, ref2)

    print("KERNEL_OK")
</pallas_src>

<mosaic_0001>
module attributes {stable_mosaic.version = 11 : i64} {
  func.func @byol_loss_kernel(%arg0: i32, %arg1: memref<8x128xf32, #tpu.memory_space<vmem>>, %arg2: memref<8x128xf32, #tpu.memory_space<vmem>>, %arg3: memref<1x1xf32, #tpu.memory_space<vmem>>, %arg4: memref<1x1xf32, #tpu.memory_space<vmem>>) attributes {dimension_semantics = [#tpu.dimension_semantics<arbitrary>], iteration_bounds = array<i64: 1>, scalar_prefetch = 0 : i64, scratch_operands = 1 : i64, tpu.core_type = #tpu.core_type<tc>, window_params = [{transform_indices = @transform_0, window_bounds = array<i64: 8, 128>}, {transform_indices = @transform_1, window_bounds = array<i64: 8, 128>}, {pipeline_mode = #tpu.pipeline_mode<synchronous>, transform_indices = @transform_2, window_bounds = array<i64: 1, 1>}]} {
    %c0_i32 = arith.constant 0 : i32
    %0 = arith.cmpi eq, %arg0, %c0_i32 : i32
    %1 = arith.extui %0 : i1 to i32
    %c0_i32_0 = arith.constant 0 : i32
    %2 = arith.cmpi ne, %1, %c0_i32_0 : i32
    scf.if %2 {
      %cst_18 = arith.constant 0.000000e+00 : f32
      %42 = vector.broadcast %cst_18 : f32 to vector<1x1xf32>
      %c0_19 = arith.constant 0 : index
      %c0_20 = arith.constant 0 : index
      %43 = vector.load %arg4[%c0_19, %c0_20] : memref<1x1xf32, #tpu.memory_space<vmem>>, vector<1x1xf32>
      tpu.vector_store %arg4[%c0_19, %c0_20], %42 {strides = array<i32>} : memref<1x1xf32, #tpu.memory_space<vmem>>, vector<1x1xf32>,
    } else {
    }
    %c0 = arith.constant 0 : index
    %c0_1 = arith.constant 0 : index
    %3 = vector.load %arg1[%c0, %c0_1] : memref<8x128xf32, #tpu.memory_space<vmem>>, vector<8x128xf32>
    %c0_2 = arith.constant 0 : index
    %c0_3 = arith.constant 0 : index
    %4 = vector.load %arg2[%c0_2, %c0_3] : memref<8x128xf32, #tpu.memory_space<vmem>>, vector<8x128xf32>
    %5 = arith.mulf %3, %3 : vector<8x128xf32>
    %cst = arith.constant dense<0.000000e+00> : vector<8xf32>
    %6 = vector.multi_reduction <add>, %5, %cst [1] : vector<8x128xf32> to vector<8xf32>
    %7 = vector.shape_cast %6 : vector<8xf32> to vector<8x1xf32>
    %8 = math.rsqrt %7 : vector<8x1xf32>
    %9 = arith.mulf %4, %4 : vector<8x128xf32>
    %cst_4 = arith.constant dense<0.000000e+00> : vector<8xf32>
    %10 = vector.multi_reduction <add>, %9, %cst_4 [1] : vector<8x128xf32> to vector<8xf32>
    %11 = vector.shape_cast %10 : vector<8xf32> to vector<8x1xf32>
    %12 = math.rsqrt %11 : vector<8x1xf32>
    %13 = arith.mulf %3, %4 : vector<8x128xf32>
    %cst_5 = arith.constant dense<0.000000e+00> : vector<8xf32>
    %14 = vector.multi_reduction <add>, %13, %cst_5 [1] : vector<8x128xf32> to vector<8xf32>
    %15 = vector.shape_cast %14 : vector<8xf32> to vector<8x1xf32>
    %cst_6 = arith.constant dense<0.000000e+00> : vector<8xf32>
    %16 = vector.multi_reduction <add>, %3, %cst_6 [1] : vector<8x128xf32> to vector<8xf32>
    %17 = vector.shape_cast %16 : vector<8xf32> to vector<8x1xf32>
    %cst_7 = arith.constant 8.000000e-01 : f32
    %18 = vector.broadcast %cst_7 : f32 to vector<8x1xf32>
    %19 = arith.mulf %18, %15 : vector<8x1xf32>
    %20 = arith.mulf %19, %8 : vector<8x1xf32>
    %21 = arith.mulf %20, %12 : vector<8x1xf32>
    %cst_8 = arith.constant 1.562500e-03 : f32
    %22 = vector.broadcast %cst_8 : f32 to vector<8x1xf32>
    %23 = arith.mulf %22, %17 : vector<8x1xf32>
    %24 = arith.mulf %23, %8 : vector<8x1xf32>
    %25 = arith.addf %21, %24 : vector<8x1xf32>
    %c8_i32 = arith.constant 8 : i32
    %26 = arith.muli %arg0, %c8_i32 : i32
    %27 = tpu.iota {dimensions = array<i32: 0>} : vector<8x1xi32>
    %28 = vector.broadcast %26 : i32 to vector<8x1xi32>
    %29 = arith.addi %28, %27 : vector<8x1xi32>
    %c8_i32_9 = arith.constant 8 : i32
    %30 = vector.broadcast %c8_i32_9 : i32 to vector<8x1xi32>
    %31 = arith.cmpi slt, %29, %30 : vector<8x1xi32>
    %cst_10 = arith.constant 0.000000e+00 : f32
    %32 = vector.broadcast %cst_10 : f32 to vector<8x1xf32>
    %33 = arith.select %31, %25, %32 : vector<8x1xi1>, vector<8x1xf32>
    %c0_11 = arith.constant 0 : index
    %c0_12 = arith.constant 0 : index
    %34 = vector.load %arg4[%c0_11, %c0_12] : memref<1x1xf32, #tpu.memory_space<vmem>>, vector<1x1xf32>
    %cst_13 = arith.constant dense<0.000000e+00> : vector<1xf32>
    %35 = vector.multi_reduction <add>, %33, %cst_13 [0] : vector<8x1xf32> to vector<1xf32>
    %36 = vector.shape_cast %35 : vector<1xf32> to vector<1x1xf32>
    %37 = arith.addf %34, %36 : vector<1x1xf32>
    %c0_14 = arith.constant 0 : index
    %c0_15 = arith.constant 0 : index
    %38 = vector.load %arg4[%c0_14, %c0_15] : memref<1x1xf32, #tpu.memory_space<vmem>>, vector<1x1xf32>
    tpu.vector_store %arg4[%c0_14, %c0_15], %37 {strides = array<i32>} : memref<1x1xf32, #tpu.memory_space<vmem>>, vector<1x1xf32>,
    %c0_i32_16 = arith.constant 0 : i32
    %39 = arith.cmpi eq, %arg0, %c0_i32_16 : i32
    %40 = arith.extui %39 : i1 to i32
    %c0_i32_17 = arith.constant 0 : i32
    %41 = arith.cmpi ne, %40, %c0_i32_17 : i32
    scf.if %41 {
      %c0_18 = arith.constant 0 : index
      %c0_19 = arith.constant 0 : index
      %42 = vector.load %arg4[%c0_18, %c0_19] : memref<1x1xf32, #tpu.memory_space<vmem>>, vector<1x1xf32>
      %cst_20 = arith.constant 1.562500e-02 : f32
      %43 = vector.broadcast %cst_20 : f32 to vector<1x1xf32>
      %44 = arith.mulf %43, %42 : vector<1x1xf32>
      %cst_21 = arith.constant 2.000000e+00 : f32
      %45 = vector.broadcast %cst_21 : f32 to vector<1x1xf32>
      %46 = arith.subf %45, %44 : vector<1x1xf32>
      %c0_22 = arith.constant 0 : index
      %c0_23 = arith.constant 0 : index
      %47 = vector.load %arg3[%c0_22, %c0_23] : memref<1x1xf32, #tpu.memory_space<vmem>>, vector<1x1xf32>
      tpu.vector_store %arg3[%c0_22, %c0_23], %46 {strides = array<i32>} : memref<1x1xf32, #tpu.memory_space<vmem>>, vector<1x1xf32>,
    } else {
    }
    return
  }
  func.func @transform_0(%arg0: i32) -> (i32, i32) {
    %c0_i32 = arith.constant 0 : i32
    %c0_i32_0 = arith.constant 0 : i32
    return %arg0, %c0_i32 : i32, i32
  }
  func.func @transform_1(%arg0: i32) -> (i32, i32) {
    %c0_i32 = arith.constant 0 : i32
    %c0_i32_0 = arith.constant 0 : i32
    return %arg0, %c0_i32 : i32, i32
  }
  func.func @transform_2(%arg0: i32) -> (i32, i32) {
    %c0_i32 = arith.constant 0 : i32
    %c0_i32_0 = arith.constant 0 : i32
    %c0_i32_1 = arith.constant 0 : i32
    return %c0_i32, %c0_i32_0 : i32, i32
  }
}

</mosaic_0001>

<bundles_post_ra>
// kernel: tpu_custom_call.1
= control target key start
LH: loop header
LB: loop body
LE: loop exit
PB: predicated region body
PF: predicated region fallthrough
CT: control target
= control target key end

     0   :  { %7 = vsyncpa [#allocation4], 0  ;;  %s244_s0 = inlined_call_operand.hbm [shape: f32[8,128], index: 0, kind: input, shape index: {}]   ;;  %s245_s1 = inlined_call_operand.hbm [shape: f32[8,128], index: 1, kind: input, shape index: {}]   ;;  %s246_s2 = inlined_call_operand.hbm [shape: f32[1,1], index: 2, kind: output, shape index: {}]  }
   0x1   :  { %8 = vsyncpa [#allocation7], 0 }
   0x2   :  { %9 = vsyncpa [#allocation5], 0  ;;  %s15_s11 = sshll.u32 %s244_s0, 4  ;;  %s213_s12 = smov [#allocation3]   ;;  %s16_s11 = int_to_ptr.hbm [resolvable:$true] %s15_s11 }
   0x3   :  { %s17_s13 = sshll.u32 %s213_s12, 4  ;;  %s26_s16 = sshll.u32 %s245_s1, 4  ;;  %s18_s13 = int_to_ptr.vmem [resolvable:$true] %s17_s13  ;;  %s27_s16 = int_to_ptr.hbm [resolvable:$true] %s26_s16 }
   0x4   :  { %20 = dma.hbm_to_vmem [thread:$0]  %s16_s11, 128, %s18_s13, [#allocation4]  }
   0x5   :  { %s214_s17 = smov [#allocation6]  }
   0x6   :  { %s28_s18 = sshll.u32 %s214_s17, 4  ;;  %s29_s18 = int_to_ptr.vmem [resolvable:$true] %s28_s18 }
   0x7   :  { %31 = dma.hbm_to_vmem [thread:$0]  %s27_s16, 128, %s29_s18, [#allocation7]  }
   0x8   :  { %207 = dma.done.wait [#allocation4], 128  }
   0x9   :  { %208 = vsyncadd [#allocation4], 4294967168 }
   0xa   :  { %209 = dma.done.wait [#allocation7], 128  }
   0xb   :  { %210 = vsyncadd [#allocation7], 4294967168  ;;  %v46_v0 = vld [vmem:[#allocation3] sm:$0xff]  ;;  %v47_v1 = vld [vmem:[#allocation6] sm:$0xff]  ;;  %vm44_vm0 = vcmask 0   ;;  %v215_v6 = vmov 0.0  }
   0xc   :  { %v48_v2 = vmul.f32 %v46_v0, %v46_v0  ;;  %v74_v3 = vmul.f32 %v47_v1, %v46_v0  ;;  %v61_v4 = vmul.f32 %v47_v1, %v47_v1  ;;  %45 = vst.msk [vmem:[#allocation2] sm:$0x1] %vm44_vm0, %v215_v6  ;;  %s216_s0 = smov [#allocation8]   ;;  %s116_s21 = sshll.u32 %s246_s2, 4  ;;  %s117_s21 = int_to_ptr.hbm [resolvable:$true] %s116_s21 }
   0xd   :  { %s114_s1 = sshll.u32 %s216_s0, 4  ;;  %s115_s1 = int_to_ptr.vmem [resolvable:$true] %s114_s1 }
   0xe   :  { %49 = vadd.xlane.f32.xlu0 %v48_v2  ;;  %75 = vadd.xlane.f32.xlu1 %v74_v3 }
  0x13   :  { %v92_v35 = vld [vmem:[#allocation2] sm:$0x1] }
  0x16   :  { %62 = vadd.xlane.f32.xlu0 %v61_v4  ;;  %77 = vadd.xlane.f32.xlu1 %v46_v0 }
  0x81   :  { %v50_v5 = vpop.xlane.xlu0 %49  ;;  %v76_v11 = vpop.xlane.xlu1 %75 }
  0x82   :  { %131 = vrsqrt.f32 %v50_v5  ;;  %vm57_vm2 = vweird.f32 %v50_v5  ;;  %v79_v20 = vmul.f32 0.8, %v76_v11 }
  0x88   :  { %v132_v7 = vpop.eup %131 }
  0x89   :  { %v52_v8 = vmul.f32 %v132_v7, %v50_v5  ;;  %v63_v9 = vpop.xlane.xlu0 %62  ;;  %vm58_vm1 = vweird.f32 %v132_v7  ;;  %v78_v19 = vpop.xlane.xlu1 %77 }
  0x8a   :  { %133 = vrsqrt.f32 %v63_v9  ;;  %vm59_vm3 = vmor %vm57_vm2, %vm58_vm1  ;;  %v82_v23 = vmul.f32 0.0015625, %v78_v19  ;;  %vm70_vm5 = vweird.f32 %v63_v9 }
  0x8b   :  { %v53_v10 = vmul.f32 %v132_v7, %v52_v8 }
  0x8d   :  { %v54_v12 = vmul.f32 0.5, %v53_v10 }
  0x8f   :  { %v55_v13 = vsub.f32 1.5, %v54_v12 }
  0x90   :  { %v134_v14 = vpop.eup %133 }
  0x91   :  { %v65_v15 = vmul.f32 %v134_v14, %v63_v9  ;;  %v56_v16 = vmul.f32 %v132_v7, %v55_v13  ;;  %vm71_vm4 = vweird.f32 %v134_v14 }
  0x92   :  { %vm72_vm6 = vmor %vm70_vm5, %vm71_vm4 }
  0x93   :  { %v66_v17 = vmul.f32 %v134_v14, %v65_v15  ;;  %v60_v21 = vsel %vm59_vm3, %v132_v7, %v56_v16 }
  0x94   :  { %v80_v25 = vmul.f32 %v79_v20, %v60_v21  ;;  %v83_v28 = vmul.f32 %v82_v23, %v60_v21 }
  0x95   :  { %v67_v18 = vmul.f32 0.5, %v66_v17 }
  0x97   :  { %v68_v22 = vsub.f32 1.5, %v67_v18 }
  0x99   :  { %v69_v24 = vmul.f32 %v134_v14, %v68_v22 }
  0x9b   :  { %v73_v26 = vsel %vm72_vm6, %v134_v14, %v69_v24 }
  0x9c   :  { %v81_v27 = vmul.f32 %v80_v25, %v73_v26 }
  0x9e   :  { %v84_v29 = vadd.f32 %v83_v28, %v81_v27 }
  0xa0   :  { %v93_v30 = vrot.slane %v84_v29, 4 }
  0xa2   :  { %v94_v31 = vadd.f32 %v93_v30, %v84_v29 }
  0xa4   :  { %v95_v32 = vrot.slane %v94_v31, 2 }
  0xa6   :  { %v96_v33 = vadd.f32 %v95_v32, %v94_v31 }
  0xa8   :  { %v97_v34 = vrot.slane %v96_v33, 1 }
  0xaa   :  { %v98_v36 = vadd.f32 %v97_v34, %v96_v33 }
  0xac   :  { %v99_v37 = vadd.f32 %v98_v36, %v92_v35 }
  0xae   :  { %101 = vst.msk [vmem:[#allocation2] sm:$0x1] %vm44_vm0, %v99_v37 }
  0xb5   :  { %v105_v38 = vld [vmem:[#allocation2] sm:$0x1] }
  0xb6   :  { %v106_v39 = vmul.f32 0.015625, %v105_v38 }
  0xb8   :  { %v107_v40 = vsub.f32 2.0, %v106_v39 }
  0xba   :  { %108 = vst.msk [vmem:[#allocation8] sm:$0x1] %vm44_vm0, %v107_v40 }
  0xbb   :  { %119 = dma.vmem_to_hbm [thread:$0]  %s115_s1, 16, %s117_s21, [#allocation5]  }
  0xbc   :  { %211 = dma.done.wait [#allocation5], 16  }
  0xbd   :  { %212 = vsyncadd [#allocation5], 4294967280 }
  0xbe   :  { %124 = vsyncpa [#allocation4], 1 }
  0xbf   :  { %125 = vsyncpa [#allocation7], 1 }
  0xc0   :  { %126 = vsyncpa [#allocation5], 1 }

</bundles_post_ra>
